<compile_context>
chip_gen: v7x
topology: tpu7x:2x2x1
jax: 0.10.0
libtpu: 0.0.40
codegen_flags: <defaults>
</compile_context>

<pallas_src>
import functools
import math

import jax
import jax.numpy as jnp
from jax.experimental import pallas as pl
from jax.experimental.pallas import tpu as pltpu


def _gqa_attn_kernel(x_ref, mask_ref, wq_ref, bq_ref, wk_ref, bk_ref,
                     wv_ref, bv_ref, out_ref, *, group, head_dim, scale):
    """One grid step = (batch b, kv-head h): attention for `group` query heads."""
    x = x_ref[0]                                   # (S, D) in the input dtype
    dt = x.dtype

    # K / V projections for this kv head (shared by all `group` query heads).
    k = (jnp.dot(x, wk_ref[0], preferred_element_type=jnp.float32)
         + bk_ref[0].astype(jnp.float32))          # (S, hd) f32 accum
    v = (jnp.dot(x, wv_ref[0], preferred_element_type=jnp.float32)
         + bv_ref[0].astype(jnp.float32))
    # Q projection for the whole query-head group in one MXU call.
    q_all = (jnp.dot(x, wq_ref[0], preferred_element_type=jnp.float32)
             + bq_ref[0].astype(jnp.float32))      # (S, group*hd) f32 accum

    k_c = k.astype(dt)
    v_c = v.astype(dt)
    m = mask_ref[0, 0].astype(jnp.float32)         # (S, S) additive mask

    outs = []
    for g in range(group):                         # static unroll, group is small
        q_g = q_all[:, g * head_dim:(g + 1) * head_dim].astype(dt)
        # q_g @ k^T without materializing a transpose (MXU "nt" matmul).
        s = jax.lax.dot_general(q_g, k_c, (((1,), (1,)), ((), ())),
                                preferred_element_type=jnp.float32) * scale
        s = s + m
        p = jax.nn.softmax(s, axis=-1)             # f32, matches torch softmax
        # TODO(synk): attn_dropout omitted (eval-mode identity); add pltpu.prng_*
        # based dropout if train-mode stochasticity is ever required.
        o = jnp.dot(p.astype(dt), v_c, preferred_element_type=jnp.float32)
        outs.append(o)

    # Single lane-dense store of the whole group tile.
    out_ref[0, 0] = jnp.concatenate(outs, axis=-1).astype(out_ref.dtype)


def rebert_self_attention(seq, mask, wq, bq, wk, bk, wv, bv, *,
                          num_heads, num_kv_heads):
    """seq: (B, S, D).  mask: additive (B, 1, S, S) or None.
    Weights are in x@W layout: wq (D, num_heads*hd), wk/wv (D, num_kv_heads*hd)
    (i.e. the transpose of PyTorch's (out, in) Linear weight).
    Returns (B, S, D) in seq.dtype."""
    B, S, D = seq.shape
    assert D % num_heads == 0 and num_heads % num_kv_heads == 0
    hd = D // num_heads
    group = num_heads // num_kv_heads
    if mask is None:
        mask = jnp.zeros((B, 1, S, S), dtype=seq.dtype)

    # kv-head axis leading -> every block covers full trailing dims.
    wq_r = wq.reshape(D, num_kv_heads, group * hd).transpose(1, 0, 2)  # (KV,D,G*hd)
    wk_r = wk.reshape(D, num_kv_heads, hd).transpose(1, 0, 2)          # (KV,D,hd)
    wv_r = wv.reshape(D, num_kv_heads, hd).transpose(1, 0, 2)
    bq_r = bq.reshape(num_kv_heads, 1, group * hd)
    bk_r = bk.reshape(num_kv_heads, 1, hd)
    bv_r = bv.reshape(num_kv_heads, 1, hd)

    kernel = functools.partial(_gqa_attn_kernel, group=group, head_dim=hd,
                               scale=1.0 / math.sqrt(hd))

    out = pl.pallas_call(
        kernel,
        out_shape=jax.ShapeDtypeStruct((B, num_kv_heads, S, group * hd),
                                       seq.dtype),
        grid_spec=pltpu.PrefetchScalarGridSpec(
            num_scalar_prefetch=0,
            grid=(B, num_kv_heads),
            in_specs=[
                pl.BlockSpec((1, S, D), lambda b, h: (b, 0, 0)),          # seq
                pl.BlockSpec((1, 1, S, S), lambda b, h: (b, 0, 0, 0)),    # mask
                pl.BlockSpec((1, D, group * hd), lambda b, h: (h, 0, 0)), # Wq grp
                pl.BlockSpec((1, 1, group * hd), lambda b, h: (h, 0, 0)), # bq grp
                pl.BlockSpec((1, D, hd), lambda b, h: (h, 0, 0)),         # Wk head
                pl.BlockSpec((1, 1, hd), lambda b, h: (h, 0, 0)),         # bk head
                pl.BlockSpec((1, D, hd), lambda b, h: (h, 0, 0)),         # Wv head
                pl.BlockSpec((1, 1, hd), lambda b, h: (h, 0, 0)),         # bv head
            ],
            out_specs=pl.BlockSpec((1, 1, S, group * hd),
                                   lambda b, h: (b, h, 0, 0)),
        ),
        compiler_params=pltpu.CompilerParams(
            dimension_semantics=("parallel", "parallel")),
    )(seq, mask, wq_r, bq_r, wk_r, bk_r, wv_r, bv_r)

    # (B, KV, S, group*hd) -> (B, S, KV, group*hd) -> (B, S, D).
    # Query head h = kv*group + g uses kv head kv, which is exactly torch's
    # repeat_interleave(k/v, group, dim=1) pairing, so this matches
    # results.permute(0, 2, 1, 3).reshape(B, S, -1).
    return out.transpose(0, 2, 1, 3).reshape(B, S, D)


def _reference(seq, mask, wq, bq, wk, bk, wv, bv, num_heads, num_kv_heads):
    """Pure-JAX mirror of ReBertBaseSelfAttention.forward (eval mode)."""
    B, S, D = seq.shape
    hd = D // num_heads
    group = num_heads // num_kv_heads
    q = (seq @ wq + bq).reshape(B, S, num_heads, hd).transpose(0, 2, 1, 3)
    k = (seq @ wk + bk).reshape(B, S, num_kv_heads, hd).transpose(0, 2, 1, 3)
    v = (seq @ wv + bv).reshape(B, S, num_kv_heads, hd).transpose(0, 2, 1, 3)
    k = jnp.repeat(k, group, axis=1)       # torch.repeat_interleave(..., dim=1)
    v = jnp.repeat(v, group, axis=1)
    scores = jnp.einsum('bhqd,bhkd->bhqk', q, k) / math.sqrt(hd)
    if mask is not None:
        scores = scores + mask
    probs = jax.nn.softmax(scores.astype(jnp.float32), axis=-1).astype(q.dtype)
    out = jnp.einsum('bhqk,bhkd->bhqd', probs, v)
    return out.transpose(0, 2, 1, 3).reshape(B, S, D)


if __name__ == "__main__":
    # Small config consistent with the module: d_model=64, 4 heads, 2 kv heads.
    B, S, D = 2, 8, 64
    num_heads, num_kv_heads = 4, 2
    hd = D // num_heads
    init_range = 0.02

    key = jax.random.PRNGKey(0)
    ks = jax.random.split(key, 7)
    seq = jax.random.normal(ks[0], (B, S, D), dtype=jnp.float32)
    wq = init_range * jax.random.normal(ks[1], (D, num_heads * hd), jnp.float32)
    bq = init_range * jax.random.normal(ks[2], (num_heads * hd,), jnp.float32)
    wk = init_range * jax.random.normal(ks[3], (D, num_kv_heads * hd), jnp.float32)
    bk = init_range * jax.random.normal(ks[4], (num_kv_heads * hd,), jnp.float32)
    wv = init_range * jax.random.normal(ks[5], (D, num_kv_heads * hd), jnp.float32)
    bv = init_range * jax.random.normal(ks[6], (num_kv_heads * hd,), jnp.float32)

    # Additive key-padding mask (0 = keep, -1e9 = masked), shape (B, 1, S, S).
    lengths = jnp.array([S, S - 3], dtype=jnp.int32)
    key_valid = jnp.arange(S)[None, :] < lengths[:, None]            # (B, S)
    mask = jnp.broadcast_to(
        jnp.where(key_valid, 0.0, -1e9).astype(jnp.float32)[:, None, None, :],
        (B, 1, S, S))

    out = rebert_self_attention(seq, mask, wq, bq, wk, bk, wv, bv,
                                num_heads=num_heads,
                                num_kv_heads=num_kv_heads)
    out = jax.block_until_ready(out)

    ref = _reference(seq, mask, wq, bq, wk, bk, wv, bv, num_heads, num_kv_heads)
    assert out.shape == (B, S, D)
    assert jnp.allclose(out, ref, atol=2e-4, rtol=2e-4), \
        float(jnp.max(jnp.abs(out - ref)))

    print("KERNEL_OK")
</pallas_src>

<mosaic_0001>
module attributes {stable_mosaic.version = 11 : i64} {
  func.func @_gqa_attn_kernel(%arg0: i32, %arg1: i32, %arg2: memref<1x8x64xf32, #tpu.memory_space<vmem>>, %arg3: memref<1x1x8x8xf32, #tpu.memory_space<vmem>>, %arg4: memref<1x64x32xf32, #tpu.memory_space<vmem>>, %arg5: memref<1x1x32xf32, #tpu.memory_space<vmem>>, %arg6: memref<1x64x16xf32, #tpu.memory_space<vmem>>, %arg7: memref<1x1x16xf32, #tpu.memory_space<vmem>>, %arg8: memref<1x64x16xf32, #tpu.memory_space<vmem>>, %arg9: memref<1x1x16xf32, #tpu.memory_space<vmem>>, %arg10: memref<1x1x8x32xf32, #tpu.memory_space<vmem>>) attributes {dimension_semantics = [#tpu.dimension_semantics<parallel>, #tpu.dimension_semantics<parallel>], iteration_bounds = array<i64: 2, 2>, scalar_prefetch = 0 : i64, scratch_operands = 0 : i64, tpu.core_type = #tpu.core_type<tc>, window_params = [{transform_indices = @transform_0, window_bounds = array<i64: 1, 8, 64>}, {transform_indices = @transform_1, window_bounds = array<i64: 1, 1, 8, 8>}, {transform_indices = @transform_2, window_bounds = array<i64: 1, 64, 32>}, {transform_indices = @transform_3, window_bounds = array<i64: 1, 1, 32>}, {transform_indices = @transform_4, window_bounds = array<i64: 1, 64, 16>}, {transform_indices = @transform_5, window_bounds = array<i64: 1, 1, 16>}, {transform_indices = @transform_6, window_bounds = array<i64: 1, 64, 16>}, {transform_indices = @transform_7, window_bounds = array<i64: 1, 1, 16>}, {transform_indices = @transform_8, window_bounds = array<i64: 1, 1, 8, 32>}]} {
    %c0 = arith.constant 0 : index
    %c0_0 = arith.constant 0 : index
    %c0_1 = arith.constant 0 : index
    %0 = vector.load %arg2[%c0, %c0_0, %c0_1] : memref<1x8x64xf32, #tpu.memory_space<vmem>>, vector<1x8x64xf32>
    %1 = vector.shape_cast %0 : vector<1x8x64xf32> to vector<8x64xf32>
    %c0_2 = arith.constant 0 : index
    %c0_3 = arith.constant 0 : index
    %c0_4 = arith.constant 0 : index
    %2 = vector.load %arg6[%c0_2, %c0_3, %c0_4] : memref<1x64x16xf32, #tpu.memory_space<vmem>>, vector<1x64x16xf32>
    %3 = vector.shape_cast %2 : vector<1x64x16xf32> to vector<64x16xf32>
    %cst = arith.constant dense<0.000000e+00> : vector<8x16xf32>
    %4 = tpu.matmul %1, %3, %cst {dimension_numbers = #tpu.dot_dimension_numbers<[1], [0], [0], [1], [0, 0, 1, 1], [], []>} : vector<8x64xf32>, vector<64x16xf32>, vector<8x16xf32> -> vector<8x16xf32>
    %c0_5 = arith.constant 0 : index
    %c0_6 = arith.constant 0 : index
    %c0_7 = arith.constant 0 : index
    %5 = vector.load %arg7[%c0_5, %c0_6, %c0_7] : memref<1x1x16xf32, #tpu.memory_space<vmem>>, vector<1x1x16xf32>
    %6 = vector.shape_cast %5 : vector<1x1x16xf32> to vector<1x16xf32>
    %7 = vector.broadcast %6 : vector<1x16xf32> to vector<8x16xf32>
    %8 = arith.addf %4, %7 : vector<8x16xf32>
    %c0_8 = arith.constant 0 : index
    %c0_9 = arith.constant 0 : index
    %c0_10 = arith.constant 0 : index
    %9 = vector.load %arg8[%c0_8, %c0_9, %c0_10] : memref<1x64x16xf32, #tpu.memory_space<vmem>>, vector<1x64x16xf32>
    %10 = vector.shape_cast %9 : vector<1x64x16xf32> to vector<64x16xf32>
    %cst_11 = arith.constant dense<0.000000e+00> : vector<8x16xf32>
    %11 = tpu.matmul %1, %10, %cst_11 {dimension_numbers = #tpu.dot_dimension_numbers<[1], [0], [0], [1], [0, 0, 1, 1], [], []>} : vector<8x64xf32>, vector<64x16xf32>, vector<8x16xf32> -> vector<8x16xf32>
    %c0_12 = arith.constant 0 : index
    %c0_13 = arith.constant 0 : index
    %c0_14 = arith.constant 0 : index
    %12 = vector.load %arg9[%c0_12, %c0_13, %c0_14] : memref<1x1x16xf32, #tpu.memory_space<vmem>>, vector<1x1x16xf32>
    %13 = vector.shape_cast %12 : vector<1x1x16xf32> to vector<1x16xf32>
    %14 = vector.broadcast %13 : vector<1x16xf32> to vector<8x16xf32>
    %15 = arith.addf %11, %14 : vector<8x16xf32>
    %c0_15 = arith.constant 0 : index
    %c0_16 = arith.constant 0 : index
    %c0_17 = arith.constant 0 : index
    %16 = vector.load %arg4[%c0_15, %c0_16, %c0_17] : memref<1x64x32xf32, #tpu.memory_space<vmem>>, vector<1x64x32xf32>
    %17 = vector.shape_cast %16 : vector<1x64x32xf32> to vector<64x32xf32>
    %cst_18 = arith.constant dense<0.000000e+00> : vector<8x32xf32>
    %18 = tpu.matmul %1, %17, %cst_18 {dimension_numbers = #tpu.dot_dimension_numbers<[1], [0], [0], [1], [0, 0, 1, 1], [], []>} : vector<8x64xf32>, vector<64x32xf32>, vector<8x32xf32> -> vector<8x32xf32>
    %c0_19 = arith.constant 0 : index
    %c0_20 = arith.constant 0 : index
    %c0_21 = arith.constant 0 : index
    %19 = vector.load %arg5[%c0_19, %c0_20, %c0_21] : memref<1x1x32xf32, #tpu.memory_space<vmem>>, vector<1x1x32xf32>
    %20 = vector.shape_cast %19 : vector<1x1x32xf32> to vector<1x32xf32>
    %21 = vector.broadcast %20 : vector<1x32xf32> to vector<8x32xf32>
    %22 = arith.addf %18, %21 : vector<8x32xf32>
    %c0_22 = arith.constant 0 : index
    %c0_23 = arith.constant 0 : index
    %c0_24 = arith.constant 0 : index
    %c0_25 = arith.constant 0 : index
    %23 = vector.load %arg3[%c0_22, %c0_23, %c0_24, %c0_25] : memref<1x1x8x8xf32, #tpu.memory_space<vmem>>, vector<1x1x8x8xf32>
    %24 = vector.shape_cast %23 : vector<1x1x8x8xf32> to vector<8x8xf32>
    %25 = vector.extract_strided_slice %22 {offsets = [0, 0], sizes = [8, 16], strides = [1, 1]} : vector<8x32xf32> to vector<8x16xf32>
    %cst_26 = arith.constant dense<0.000000e+00> : vector<8x8xf32>
    %26 = tpu.matmul %25, %8, %cst_26 {dimension_numbers = #tpu.dot_dimension_numbers<[1], [1], [0], [0], [0, 0, 1, 0], [], []>} : vector<8x16xf32>, vector<8x16xf32>, vector<8x8xf32> -> vector<8x8xf32>
    %cst_27 = arith.constant 2.500000e-01 : f32
    %27 = vector.broadcast %cst_27 : f32 to vector<8x8xf32>
    %28 = arith.mulf %26, %27 : vector<8x8xf32>
    %29 = arith.addf %28, %24 : vector<8x8xf32>
    %cst_28 = arith.constant dense<0xFF800000> : vector<8xf32>
    %30 = vector.multi_reduction <maximumf>, %29, %cst_28 [1] : vector<8x8xf32> to vector<8xf32>
    %cst_29 = arith.constant 0xFF800000 : f32
    %31 = vector.broadcast %cst_29 : f32 to vector<8xf32>
    %32 = arith.maximumf %31, %30 : vector<8xf32>
    %33 = vector.shape_cast %32 : vector<8xf32> to vector<8x1xf32>
    %34 = vector.broadcast %33 : vector<8x1xf32> to vector<8x8xf32>
    %35 = arith.subf %29, %34 : vector<8x8xf32>
    %36 = math.exp %35 : vector<8x8xf32>
    %cst_30 = arith.constant dense<0.000000e+00> : vector<8xf32>
    %37 = vector.multi_reduction <add>, %36, %cst_30 [1] : vector<8x8xf32> to vector<8xf32>
    %38 = vector.shape_cast %37 : vector<8xf32> to vector<8x1xf32>
    %39 = vector.broadcast %38 : vector<8x1xf32> to vector<8x8xf32>
    %40 = arith.divf %36, %39 : vector<8x8xf32>
    %cst_31 = arith.constant dense<0.000000e+00> : vector<8x16xf32>
    %41 = tpu.matmul %40, %15, %cst_31 {dimension_numbers = #tpu.dot_dimension_numbers<[1], [0], [0], [1], [0, 0, 1, 1], [], []>} : vector<8x8xf32>, vector<8x16xf32>, vector<8x16xf32> -> vector<8x16xf32>
    %42 = vector.extract_strided_slice %22 {offsets = [0, 16], sizes = [8, 16], strides = [1, 1]} : vector<8x32xf32> to vector<8x16xf32>
    %cst_32 = arith.constant dense<0.000000e+00> : vector<8x8xf32>
    %43 = tpu.matmul %42, %8, %cst_32 {dimension_numbers = #tpu.dot_dimension_numbers<[1], [1], [0], [0], [0, 0, 1, 0], [], []>} : vector<8x16xf32>, vector<8x16xf32>, vector<8x8xf32> -> vector<8x8xf32>
    %cst_33 = arith.constant 2.500000e-01 : f32
    %44 = vector.broadcast %cst_33 : f32 to vector<8x8xf32>
    %45 = arith.mulf %43, %44 : vector<8x8xf32>
    %46 = arith.addf %45, %24 : vector<8x8xf32>
    %cst_34 = arith.constant dense<0xFF800000> : vector<8xf32>
    %47 = vector.multi_reduction <maximumf>, %46, %cst_34 [1] : vector<8x8xf32> to vector<8xf32>
    %cst_35 = arith.constant 0xFF800000 : f32
    %48 = vector.broadcast %cst_35 : f32 to vector<8xf32>
    %49 = arith.maximumf %48, %47 : vector<8xf32>
    %50 = vector.shape_cast %49 : vector<8xf32> to vector<8x1xf32>
    %51 = vector.broadcast %50 : vector<8x1xf32> to vector<8x8xf32>
    %52 = arith.subf %46, %51 : vector<8x8xf32>
    %53 = math.exp %52 : vector<8x8xf32>
    %cst_36 = arith.constant dense<0.000000e+00> : vector<8xf32>
    %54 = vector.multi_reduction <add>, %53, %cst_36 [1] : vector<8x8xf32> to vector<8xf32>
    %55 = vector.shape_cast %54 : vector<8xf32> to vector<8x1xf32>
    %56 = vector.broadcast %55 : vector<8x1xf32> to vector<8x8xf32>
    %57 = arith.divf %53, %56 : vector<8x8xf32>
    %cst_37 = arith.constant dense<0.000000e+00> : vector<8x16xf32>
    %58 = tpu.matmul %57, %15, %cst_37 {dimension_numbers = #tpu.dot_dimension_numbers<[1], [0], [0], [1], [0, 0, 1, 1], [], []>} : vector<8x8xf32>, vector<8x16xf32>, vector<8x16xf32> -> vector<8x16xf32>
    %59 = tpu.concatenate %41, %58 in 1 : vector<8x16xf32>, vector<8x16xf32> -> vector<8x32xf32>
    %c0_38 = arith.constant 0 : index
    %c0_39 = arith.constant 0 : index
    %c0_40 = arith.constant 0 : index
    %c0_41 = arith.constant 0 : index
    %60 = vector.load %arg10[%c0_38, %c0_39, %c0_40, %c0_41] : memref<1x1x8x32xf32, #tpu.memory_space<vmem>>, vector<1x1x8x32xf32>
    %61 = vector.shape_cast %60 : vector<1x1x8x32xf32> to vector<8x32xf32>
    %62 = vector.shape_cast %59 : vector<8x32xf32> to vector<1x1x8x32xf32>
    tpu.vector_store %arg10[%c0_38, %c0_39, %c0_40, %c0_41], %62 {strides = array<i32>} : memref<1x1x8x32xf32, #tpu.memory_space<vmem>>, vector<1x1x8x32xf32>,
    return
  }
  func.func @transform_0(%arg0: i32, %arg1: i32) -> (i32, i32, i32) {
    %c0_i32 = arith.constant 0 : i32
    %c0_i32_0 = arith.constant 0 : i32
    %c0_i32_1 = arith.constant 0 : i32
    return %arg0, %c0_i32, %c0_i32_0 : i32, i32, i32
  }
  func.func @transform_1(%arg0: i32, %arg1: i32) -> (i32, i32, i32, i32) {
    %c0_i32 = arith.constant 0 : i32
    %c0_i32_0 = arith.constant 0 : i32
    %c0_i32_1 = arith.constant 0 : i32
    %c0_i32_2 = arith.constant 0 : i32
    return %arg0, %c0_i32, %c0_i32_0, %c0_i32_1 : i32, i32, i32, i32
  }
  func.func @transform_2(%arg0: i32, %arg1: i32) -> (i32, i32, i32) {
    %c0_i32 = arith.constant 0 : i32
    %c0_i32_0 = arith.constant 0 : i32
    %c0_i32_1 = arith.constant 0 : i32
    return %arg1, %c0_i32, %c0_i32_0 : i32, i32, i32
  }
  func.func @transform_3(%arg0: i32, %arg1: i32) -> (i32, i32, i32) {
    %c0_i32 = arith.constant 0 : i32
    %c0_i32_0 = arith.constant 0 : i32
    %c0_i32_1 = arith.constant 0 : i32
    return %arg1, %c0_i32, %c0_i32_0 : i32, i32, i32
  }
  func.func @transform_4(%arg0: i32, %arg1: i32) -> (i32, i32, i32) {
    %c0_i32 = arith.constant 0 : i32
    %c0_i32_0 = arith.constant 0 : i32
    %c0_i32_1 = arith.constant 0 : i32
    return %arg1, %c0_i32, %c0_i32_0 : i32, i32, i32
  }
  func.func @transform_5(%arg0: i32, %arg1: i32) -> (i32, i32, i32) {
    %c0_i32 = arith.constant 0 : i32
    %c0_i32_0 = arith.constant 0 : i32
    %c0_i32_1 = arith.constant 0 : i32
    return %arg1, %c0_i32, %c0_i32_0 : i32, i32, i32
  }
  func.func @transform_6(%arg0: i32, %arg1: i32) -> (i32, i32, i32) {
    %c0_i32 = arith.constant 0 : i32
    %c0_i32_0 = arith.constant 0 : i32
    %c0_i32_1 = arith.constant 0 : i32
    return %arg1, %c0_i32, %c0_i32_0 : i32, i32, i32
  }
  func.func @transform_7(%arg0: i32, %arg1: i32) -> (i32, i32, i32) {
    %c0_i32 = arith.constant 0 : i32
    %c0_i32_0 = arith.constant 0 : i32
    %c0_i32_1 = arith.constant 0 : i32
    return %arg1, %c0_i32, %c0_i32_0 : i32, i32, i32
  }
  func.func @transform_8(%arg0: i32, %arg1: i32) -> (i32, i32, i32, i32) {
    %c0_i32 = arith.constant 0 : i32
    %c0_i32_0 = arith.constant 0 : i32
    %c0_i32_1 = arith.constant 0 : i32
    return %arg0, %arg1, %c0_i32, %c0_i32_0 : i32, i32, i32, i32
  }
}

</mosaic_0001>

<bundles_post_ra>
// kernel: tpu_custom_call.1
= control target key start
LH: loop header
LB: loop body
LE: loop exit
PB: predicated region body
PF: predicated region fallthrough
CT: control target
= control target key end

     0   :  { %s1837_s0 = inlined_call_operand.vmem [shape: f32[2,8,64], index: 0, kind: input, shape index: {}]   ;;  %s1838_s1 = inlined_call_operand.vmem [shape: f32[2,1,8,8], index: 1, kind: input, shape index: {}]   ;;  %s1839_s2 = inlined_call_operand.vmem [shape: f32[2,64,32], index: 2, kind: input, shape index: {}]   ;;  %s1840_s3 = inlined_call_operand.vmem [shape: f32[2,1,32], index: 3, kind: input, shape index: {}]   ;;  %s1841_s4 = inlined_call_operand.vmem [shape: f32[2,64,16], index: 4, kind: input, shape index: {}]   ;;  %s1842_s5 = inlined_call_operand.vmem [shape: f32[2,1,16], index: 5, kind: input, shape index: {}]   ;;  %s1843_s6 = inlined_call_operand.vmem [shape: f32[2,64,16], index: 6, kind: input, shape index: {}]   ;;  %s1844_s7 = inlined_call_operand.vmem [shape: f32[2,1,16], index: 7, kind: input, shape index: {}]   ;;  %s1845_s8 = inlined_call_operand.hbm [shape: f32[2,2,8,32], index: 8, kind: output, shape index: {}]  }
   0x1   :  { %1847 = sst [smem:[#allocation5_spill]] %s1837_s0 }
   0x2   :  { %1848 = sst [smem:[#allocation6_spill]] %s1838_s1 }
   0x3   :  { %13 = vsyncpa [#allocation3], 0 }
   0x4   :  { %15 = vsyncpa [#allocation3 + $0x1], 0  ;;  %s1602_s27 = smov 0   ;;  %s1604_s28 = smov 0  }
   0x5   :  { %s1606_s29 = smov 0   ;;  %s1608_s30 = smov 0  }
   0x6   :  { %s1610_s9 = smov 0   ;;  %s1612_s10 = smov 0  }
   0x7   :  { %s1614_s11 = smov 0   ;;  %s1616_s12 = smov 0  }
   0x8 LB: > { %s1189_s13 = sadd.s32 4294967295, %s1549_s12   ;;  %s1190_s14 = sadd.s32 4294967294, %s1549_s12   ;;  %s1549_s12 = sphi %s1616_s12, %s21_s12   ;;  %s1545_s11 = sphi %s1614_s11, %s1860_s11   ;;  %s1541_s10 = sphi %s1612_s10, %s1859_s10   ;;  %s1537_s9 = sphi %s1610_s9, %s1858_s9   ;;  %s1533_s30 = sphi %s1608_s30, %s1857_s30   ;;  %s1529_s29 = sphi %s1606_s29, %s1856_s29   ;;  %s1525_s28 = sphi %s1604_s28, %s1855_s28   ;;  %s1521_s27 = sphi %s1602_s27, %s1854_s27  }
   0x9   : > { %s30_s15 = sadd.s32 1, %s1541_s10  ;;  %s33_s16 = sadd.s32 1, %s1545_s11 }
   0xa   : > { %p31_p0 = scmp.ge.s32.totalorder %s30_s15, 2  ;;  %p260_p1 = scmp.ne.s32.totalorder %s1529_s29, %s1525_s28 }
   0xb   : > { %p261_p2 = scmp.eq.s32.totalorder %s1189_s13, 3  ;;  %p266_p5 = scmp.ne.s32.totalorder %s1525_s28, %s1521_s27 }
   0xc   : > { %s1862_s15 = smov (%p31_p0, %s30_s15), 0  ;;  %s1864_s16 = smov (!%p31_p0, %s33_s16), %s1545_s11 }
   0xd   : > { %s246_s17 = ssub.s32 %s1541_s10, %s1862_s15  ;;  %p1653_p3 = por %p261_p2, %p260_p1 }
   0xe   : > { %p35_p4 = scmp.ge.s32.totalorder %s1864_s16, 2  ;;  %p267_p6 = scmp.eq.s32.totalorder %s1190_s14, 3 }
   0xf   : > { %p1193_p7 = scmp.ge.s32.totalorder %s1549_s12, 1  ;;  %p341_p9 = scmp.lt.s32.totalorder %s1549_s12, 5 }
  0x10   : > { %s1866_s16 = smov (%p35_p4, %s1864_s16), 0  ;;  %p1662_p8 = por %p267_p6, %p266_p5 }
  0x11   : > { %s245_s20 = ssub.s32 %s1545_s11, %s1866_s16  ;;  %s250_s21 = sadd.s32 1, %s1529_s29 }
  0x12   : > { %s247_s22 = sor.u32 %s246_s17, %s245_s20  ;;  %p342_p10 = pnand %p1193_p7, %p341_p9 }
  0x13   : > { %p248_p11 = scmp.eq.s32.totalorder %s247_s22, 0  ;;  %p410_p12 = scmp.lt.s32.totalorder (!%p342_p10), %s1533_s30, 1  ;;  %v1551_v0 = vmov (!%p342_p10), 0.0|0.0   ;;  %vm1552_vm0 = vmmov (!%p342_p10), 0   ;;  %v1553_v1 = vmov (!%p342_p10), 0.0   ;;  %vm450_vm1 = vcmask (!%p342_p10), 523264  }
  0x14   : > { %345 = sbr.rel (%p342_p10) target bundleno = 1685 (0x695), region = 52  ;;  %1335 = vmatprep.subr.bf16.mxu0 (!%p342_p10), %v1551_v0  ;;  %1274 = vmatprep.mubr.msk.f32.mxu0 (!%p342_p10), %vm1552_vm0, %v1553_v1  ;;  %p402_p13 = scmp.lt.s32.totalorder (!%p342_p10), %s1537_s9, 1  ;;  %vm695_vm2 = vcmask (!%p342_p10), 130048   ;;  %vm774_vm3 = vcmask (!%p342_p10), 64512   ;;  %vm1024_vm4 = vcmask (!%p342_p10), 261120  }
  0x15   : > { %s1671_s23 = scalar_select %p248_p11, %s1529_s29, %s250_s21  }
  0x16   : > { %1347 = vmatprep.subr.bf16.mxu1 (!%p342_p10), %v1551_v0  ;;  %1293 = vmatprep.mubr.msk.f32.mxu1 (!%p342_p10), %vm1552_vm0, %v1553_v1  ;;  %s1851_s0 = sld [smem:[#allocation5_spill]] (!%p342_p10)  ;;  %s1554_s13 = smov (!%p342_p10), 112  }
  0x17   : > { %s1853_s1 = sld [smem:[#allocation6_spill]] (!%p342_p10) }
  0x1b   : > { %s1678_s24 = scalar_select %p410_p12, %s1533_s30, 1 }
  0x1c   : > { %s1695_s22 = scalar_select %p402_p13, %s1537_s9, 1 }
  0x1d   : > { %s1220_s25 = sshll.u32 %s1678_s24, 6 }
  0x1e   : > { %s422_s14 = scalar_lea.vmem %s1841_s4, %s1220_s25  ;;  %s1691_s21 = scalar_lea.vmem %s1843_s6, %s1220_s25 }
  0x1f   : > { %v435_v2 = vld [vmem:[%s422_s14] sm:$0xff]  ;;  %v436_v3 = vld [vmem:[%s422_s14 + $0x8] sm:$0xff]  ;;  %v437_v4 = vld [vmem:[%s422_s14 + $0x10] sm:$0xff]  ;;  %s1705_s17 = scalar_lea.vmem %s1839_s2, %s1220_s25  ;;  %s1846_s20 = sshll.u32 %s1695_s22, 3 }
  0x20   : > { %v1336_v5 = vpack.c.bf16 %v436_v3, %v435_v2  ;;  %v438_v6 = vld [vmem:[%s422_s14 + $0x18] sm:$0xff]  ;;  %v439_v8 = vld [vmem:[%s422_s14 + $0x20] sm:$0xff]  ;;  %v440_v9 = vld [vmem:[%s422_s14 + $0x28] sm:$0xff]  ;;  %s405_s26 = scalar_lea.vmem %s1851_s0, %s1846_s20  ;;  %s425_s25 = scalar_lea.vmem %s1842_s5, %s1678_s24 }
  0x21   : > { %v1339_v7 = vpack.c.bf16 %v438_v6, %v437_v4  ;;  %v524_v10 = vld [vmem:[%s1691_s21] sm:$0xff]  ;;  %v525_v11 = vld [vmem:[%s1691_s21 + $0x8] sm:$0xff]  ;;  %v526_v12 = vld [vmem:[%s1691_s21 + $0x10] sm:$0xff]  ;;  %v1342_v14 = vpack.c.bf16 %v440_v9, %v439_v8  ;;  %s399_s20 = sand.u32 1, %s1525_s28  }
  0x22   : > { %1337 = vmatpush3.bf16.msra.mxu0 %v1336_v5  ;;  %v527_v13 = vld [vmem:[%s1691_s21 + $0x18] sm:$0xff]  ;;  %v1348_v15 = vpack.c.bf16 %v525_v11, %v524_v10  ;;  %v441_v16 = vld [vmem:[%s422_s14 + $0x30] sm:$0xff]  ;;  %v528_v19 = vld [vmem:[%s1691_s21 + $0x20] sm:$0xff] }
  0x23   : > { %1338 = vmatprep.subr.bf16.mxu0 %v1551_v0  ;;  %v442_v17 = vld [vmem:[%s422_s14 + $0x38] sm:$0xff]  ;;  %v1351_v18 = vpack.c.bf16 %v527_v13, %v526_v12  ;;  %v529_v20 = vld [vmem:[%s1691_s21 + $0x28] sm:$0xff]  ;;  %v609_v22 = vld [vmem:[%s1705_s17] sm:$0xff]  ;;  %s1194_s14 = sshll.u32 %s399_s20, 3 }
  0x24   : > { %1349 = vmatpush3.bf16.msra.mxu1 %v1348_v15  ;;  %v1345_v21 = vpack.c.bf16 %v442_v17, %v441_v16  ;;  %v610_v23 = vld [vmem:[%s1705_s17 + $0x8] sm:$0xff]  ;;  %v1354_v24 = vpack.c.bf16 %v529_v20, %v528_v19  ;;  %v530_v25 = vld [vmem:[%s1691_s21 + $0x30] sm:$0xff]  ;;  %v531_v26 = vld [vmem:[%s1691_s21 + $0x38] sm:$0xff]  ;;  %s417_s21 = scalar_lea.vmem %s1840_s3, %s1678_s24 }
  0x25   : > { %1350 = vmatprep.subr.bf16.mxu1 %v1551_v0  ;;  %v434_v27 = vld [vmem:[%s405_s26] sm:$0xff]  ;;  %v1360_v28 = vpack.c.bf16 %v610_v23, %v609_v22  ;;  %v611_v29 = vld [vmem:[%s1705_s17 + $0x10] sm:$0xff]  ;;  %v612_v30 = vld [vmem:[%s1705_s17 + $0x18] sm:$0xff]  ;;  %v1357_v31 = vpack.c.bf16 %v531_v26, %v530_v25  ;;  %s433_s26 = scalar_lea.vmem %s1844_s7, %s1678_s24 }
  0x26   : > { %1340 = vmatpush3.bf16.msra.mxu0 %v1339_v7  ;;  %v1363_v32 = vpack.c.bf16 %v612_v30, %v611_v29  ;;  %v613_v33 = vld [vmem:[%s1705_s17 + $0x20] sm:$0xff]  ;;  %v614_v34 = vld [vmem:[%s1705_s17 + $0x28] sm:$0xff]  ;;  %v615_v36 = vld [vmem:[%s1705_s17 + $0x30] sm:$0xff] }
  0x27   : > { %1341 = vmatprep.subr.bf16.mxu0 %v1551_v0  ;;  %v1366_v35 = vpack.c.bf16 %v614_v34, %v613_v33  ;;  %v616_v37 = vld [vmem:[%s1705_s17 + $0x38] sm:$0xff]  ;;  %v1203_v39 = vld [vmem:[%s425_s25] ss:$0 sm:$0xff]  ;;  %s1852_s25 = sshll.u32 %s1695_s22, 3  ;;  %s1555_s22 = smov 16  }
  0x28   : > { %1352 = vmatpush3.bf16.msra.mxu1 %v1351_v18  ;;  %v1369_v38 = vpack.c.bf16 %v616_v37, %v615_v36  ;;  %v1205_v45 = vld [vmem:[%s433_s26] ss:$0 sm:$0xff]  ;;  %s409_s24 = scalar_lea.vmem %s1853_s1, %s1852_s25  ;;  %s1216_s26 = sshll.u32 %s1537_s9, 1 }
  0x29   : > { %1353 = vmatprep.subr.bf16.mxu1 %v1551_v0  ;;  %v1207_v46 = vld [vmem:[%s417_s21] ss:$0 sm:$0xff]  ;;  %s1038_s21 = sadd.s32 %s1533_s30, %s1216_s26  ;;  %s401_s25 = scalar_lea.vmem [#allocation2], %s1194_s14 }
  0x2a   : > { %1343 = vmatpush3.bf16.msra.mxu0 %v1342_v14  ;;  %v694_v52 = vld [vmem:[%s409_s24] sm:$0xff]  ;;  %s1042_s17 = sshll.u32 %s401_s25, 4  ;;  %s1027_s9 = scalar_lea.sflag [#allocation3], %s399_s20  ;;  %s1785_s17 = int_to_ptr.vmem [resolvable:$true] %s1042_s17 }
  0x2b   : > { %1344 = vmatprep.subr.bf16.mxu0 %v1551_v0  ;;  %s1455_s30 = scalar_lea.vmem %s1785_s17, 128 }
  0x2c   : > { %1355 = vmatpush3.bf16.msra.mxu1 %v1354_v24  ;;  %p1456_p0 = scmp.ne.s32.totalorder %s1785_s17, %s1455_s30 }
  0x2d   : > { %1356 = vmatprep.subr.bf16.mxu1 %v1551_v0 }
  0x2e   : > { %1346 = vmatpush3.bf16.msra.mxu0 %v1345_v21  ;;  %p1457_p1 = pnand %p1456_p0, %p1653_p3 }
  0x2f   : > { %1359 = vmatprep.subr.bf16.mxu0 %v1551_v0 }
  0x30   : > { %1358 = vmatpush3.bf16.msra.mxu1 %v1357_v31  ;;  %p1458_p2 = pneg %p1457_p1 }
  0x31   : > { %1275 = vmatmul.mubr.msk.f32.vlgmr.msra.gmra.mrb[0].mxu0 %vm450_vm1, %v434_v27  ;;  %1315 = vmatprep.subr.mxu1 %v1553_v1 }
  0x32   : > { %1361 = vmatpush3.bf16.msra.mxu0 %v1360_v28  ;;  %1312 = vmatprep.mubr.msk.f32.mxu0 %vm1552_vm0, %v1553_v1 }
  0x33   : > { %1362 = vmatprep.subr.bf16.mxu0 %v1551_v0  ;;  %1294 = vmatmul.mubr.msk.f32.vlgmr.msra.gmra.mrb[0].mxu1 %vm450_vm1, %v434_v27 }
  0x34   : > { %1317 = vmatprep.mubr.msk.f32.mxu1 %vm1552_vm0, %v1553_v1 }
  0x36   : > { %1364 = vmatpush3.bf16.msra.mxu0 %v1363_v32 }
  0x37   : > { %1365 = vmatprep.subr.bf16.mxu0 %v1551_v0 }
  0x3a   : > { %1367 = vmatpush3.bf16.msra.mxu0 %v1366_v35 }
  0x3b   : > { %1368 = vmatprep.subr.bf16.mxu0 %v1551_v0 }
  0x3e   : > { %1370 = vmatpush3.bf16.msra.mxu0 %v1369_v38 }
  0x41   : > { %1313 = vmatmul.mubr.msk.f32.vlgmr.msra.gmra.mrb[2].mxu0 %vm450_vm1, %v434_v27 }
 0x104   : > { %v520_v40 = vpop.f32.mrb[0].mxu0 }
 0x105   : > { %v521_v41 = vadd.f32 %v1203_v39, %v520_v40  ;;  %v1276_v42 = vpop.f32.mrb[1].mxu0 }
 0x106   : > { %v605_v43 = vpop.f32.mrb[0].mxu1 }
 0x107   : > { %1316 = vmatpush3.xpose.msk.msra.mxu1 %vm695_vm2, %v521_v41  ;;  %v1295_v44 = vpop.f32.mrb[1].mxu1  ;;  %v606_v48 = vadd.f32 %v1205_v45, %v605_v43 }
 0x108   : > { %1320 = vmatprep.subr.mxu1 %v1553_v1 }
 0x114   : > { %v690_v47 = vpop.f32.mrb[2].mxu0 }
 0x115   : > { %v691_v49 = vadd.f32 %v1207_v46, %v690_v47  ;;  %v1314_v50 = vpop.f32.mrb[3].mxu0 }
 0x117   : > { %859 = vrot.lane.b32.xlu1 %v691_v49, %s1554_s13  ;;  %1318 = vmatmul.mubr.msk.f32.vlgmr.msra.gmra.mrb[2].mxu1 %vm695_vm2, %v691_v49  ;;  %s1217_s13 = sshll.u32 %s1038_s21, 7 }
 0x118   : > { %1321 = vmatpush3.msra.mxu1 %v606_v48  ;;  %1322 = vmatprep.mubr.msk.f32.mxu1 %vm1552_vm0, %v1553_v1  ;;  %s1783_s1 = scalar_lea.hbm %s1845_s8, %s1217_s13 }
 0x119   : > { %1325 = vmatprep.subr.mxu1 %v1553_v1 }
 0x189   : > { %v860_v2 = vpop.permute.xlu1 %859 }
 0x1ea   : > { %v768_v51 = vpop.f32.mrb[2].mxu1 }
 0x1eb   : > { %v772_v53 = vmul.f32 0.25, %v768_v51  ;;  %v1319_v54 = vpop.f32.mrb[3].mxu1 }
 0x1ed   : > { %v773_v55 = vadd.f32 %v772_v53, %v694_v52 }
 0x1ef   : > { %v775_v56 = vsel %vm774_vm3, %v773_v55, -inf }
 0x1f0   : > { %776 = vmax.xlane.f32.xlu0 %v775_v56 }
 0x27d   : > { %v777_v57 = vpop.xlane.xlu0 %776 }
 0x27e   : > { %v778_v58 = vsub.f32 %v773_v55, %v777_v57 }
 0x280   : > { %v779_v59 = vmul.f32 1.442695, %v778_v58 }
 0x282   : > { %1447 = vpow2.f32 %v779_v59 }
 0x28c   : > { %v1448_v60 = vpop.eup %1447 }
 0x28d   : > { %v781_v61 = vsel %vm774_vm3, %v1448_v60, 0.0 }
 0x28e   : > { %782 = vadd.xlane.f32.xlu0 %v781_v61 }
 0x31b   : > { %v783_v62 = vpop.xlane.xlu0 %782 }
 0x31c   : > { %1449 = vrcp.f32 %v783_v62 }
 0x326   : > { %v1450_v63 = vpop.eup %1449 }
 0x327   : > { %v785_v0 = vmul.f32 %v1450_v63, %v1448_v60 }
 0x329   : > { %1323 = vmatmul.mubr.msk.f32.vlgmr.msra.gmra.mrb[4].mxu1 %vm774_vm3, %v785_v0 }
 0x32a   : > { %1326 = vmatpush3.xpose.msk.msra.mxu1 %vm695_vm2, %v521_v41  ;;  %1327 = vmatprep.mubr.msk.f32.mxu1 %vm1552_vm0, %v1553_v1 }
 0x32b   : > { %1330 = vmatprep.subr.mxu1 %v1553_v1 }
 0x32d   : > { %1328 = vmatmul.mubr.msk.f32.vlgmr.msra.gmra.mrb[6].mxu1 %vm695_vm2, %v860_v2 }
 0x32e   : > { %1331 = vmatpush3.msra.mxu1 %v606_v48  ;;  %1332 = vmatprep.mubr.msk.f32.mxu1 %vm1552_vm0, %v1553_v1 }
 0x3fc   : > { %v855_v3 = vpop.f32.mrb[4].mxu1 }
 0x3fd   : > { %v1324_v4 = vpop.f32.mrb[5].mxu1 }
 0x400   : > { %v929_v5 = vpop.f32.mrb[6].mxu1 }
 0x401   : > { %v933_v6 = vmul.f32 0.25, %v929_v5  ;;  %v1329_v7 = vpop.f32.mrb[7].mxu1 }
 0x403   : > { %v934_v8 = vadd.f32 %v933_v6, %v694_v52 }
 0x405   : > { %v935_v9 = vsel %vm774_vm3, %v934_v8, -inf }
 0x406   : > { %936 = vmax.xlane.f32.xlu1 %v935_v9 }
 0x493   : > { %v937_v10 = vpop.xlane.xlu1 %936 }
 0x494   : > { %v938_v11 = vsub.f32 %v934_v8, %v937_v10 }
 0x496   : > { %v939_v12 = vmul.f32 1.442695, %v938_v11 }
 0x498   : > { %1451 = vpow2.f32 %v939_v12 }
 0x4a2   : > { %v1452_v13 = vpop.eup %1451 }
 0x4a3   : > { %v941_v14 = vsel %vm774_vm3, %v1452_v13, 0.0 }
 0x4a4   : > { %942 = vadd.xlane.f32.xlu0 %v941_v14 }
 0x531   : > { %v943_v1 = vpop.xlane.xlu0 %942 }
 0x532   : > { %1453 = vrcp.f32 %v943_v1 }
 0x53c   : > { %v1454_v15 = vpop.eup %1453 }
 0x53d   : > { %v945_v16 = vmul.f32 %v1454_v15, %v1452_v13 }
 0x53f   : > { %1333 = vmatmul.mubr.msk.f32.vlgmr.msra.gmra.mrb[8].mxu1 %vm774_vm3, %v945_v16 }
 0x612   : > { %v1015_v17 = vpop.f32.mrb[8].mxu1 }
 0x613   : > { %1020 = vrot.lane.b32.xlu0 %v1015_v17, %s1555_s22  ;;  %v1334_v18 = vpop.f32.mrb[9].mxu1  ;;  %s1556_s22 = smov [#allocation2]  }
 0x614   : > { %s1459_s14 = sshll.u32 %s1556_s22, 4  ;;  %s1460_s14 = int_to_ptr.vmem [resolvable:$false] %s1459_s14 }
 0x615   : > { %s1461_s26 = scalar_lea.vmem %s1460_s14, 256  ;;  %p1462_p4 = scmp.lt.s32.totalorder %s1785_s17, %s1460_s14 }
 0x616   : > { %p1463_p5 = scmp.lt.s32.totalorder %s1461_s26, %s1455_s30 }
 0x618   : > { %p1464_p6 = por %p1463_p5, %p1462_p4 }
 0x61a   : > { %p1465_p7 = pnand %p1464_p6, %p1458_p2 }
 0x685   : > { %v1021_v19 = vpop.permute.xlu0 %1020 }
 0x686   : > { %v1023_v20 = vsel %vm695_vm2, %v855_v3, %v1021_v19 }
 0x687   : > { %1025 = vst.msk [vmem:[%s401_s25] sm:$0xff] %vm1024_vm4, %v1023_v20 }
 0x688   : > { %1468 = shalt.err (!%p1465_p7)
}
 0x689   : > { %s1469_s20 = scalar_lea.hbm %s1783_s1, 128  ;;  %s1473_s25 = scalar_lea.hbm %s1845_s8, 512 }
 0x68a   : > { %p1470_p9 = scmp.ne.s32.totalorder %s1783_s1, %s1469_s20  ;;  %p1474_p12 = scmp.lt.u32.totalorder %s1783_s1, %s1845_s8 }
 0x68b   : > { %p1475_p13 = scmp.lt.u32.totalorder %s1473_s25, %s1469_s20  ;;  %p1477_p1 = scmp.lt.u32.totalorder %s1469_s20, %s1783_s1 }
 0x68c   : > { %p1471_p10 = pnand %p1470_p9, %p1653_p3 }
 0x68d   : > { %p1476_p0 = por %p1475_p13, %p1474_p12 }
 0x68e   : > { %p1472_p11 = pneg %p1471_p10 }
 0x68f   : > { %p1478_p2 = por %p1477_p1, %p1476_p0 }
 0x691   : > { %p1479_p4 = pnand %p1478_p2, %p1472_p11 }
 0x693   : > { %1482 = shalt.err (!%p1479_p4)
}
 0x694   : > { %1371 = dma.vmem_to_hbm [thread:$0]  (%p1653_p3), %s1785_s17, 128, %s1783_s1, %s1027_s9  }
 0x695 PF: > { %p1377_p5 = scmp.ge.s32.totalorder %s1549_s12, 2  ;;  %s1054_s30 = sand.u32 1, %s1521_s27  }
 0x696   : > { %s1055_s22 = scalar_lea.sflag [#allocation3], %s1054_s30 }
 0x697   : > { %p1374_p6 = pnand %p1377_p5, %p1662_p8 }
 0x699   : > { %1516 = dma.done.wait (!%p1374_p6), %s1055_s22, 128  }
 0x69a   : > { %1518 = vsyncadd (!%p1374_p6), %s1055_s22, 4294967168  ;;  %s21_s12 = sadd.s32 1, %s1549_s12   ;;  %s1854_s27 = smov %s1525_s28 }
 0x69b   : > { %p18_p7 = scmp.ge.s32.totalorder %s21_s12, 6   ;;  %s1855_s28 = smov %s1529_s29 }
 0x69c   : > { %s1856_s29 = smov %s1671_s23  ;;  %s1857_s30 = smov %s1541_s10 }
 0x69d   : > { %s1858_s9 = smov %s1545_s11  ;;  %s1859_s10 = smov %s1862_s15 }
 0x69e   : > { %s1860_s11 = smov %s1866_s16  ;;  %20 = sbr.rel (!%p18_p7) target bundleno = 8 (0x8), region = 108 }
 0x6a5   :  { %1060 = vsyncpa [#allocation3], 1 }
 0x6a6   :  { %1062 = vsyncpa [#allocation3 + $0x1], 1 }

</bundles_post_ra>
